<compile_context>
chip_gen: v7x
topology: tpu7x:2x2x1
jax: 0.10.0
libtpu: 0.0.40
codegen_flags: <defaults>
</compile_context>

<pallas_src>
import math
import numpy as np
import jax
import jax.numpy as jnp
from jax.experimental import pallas as pl
from jax.experimental.pallas import tpu as pltpu

B = 2          # batch
FEAT = 32      # feat_dim (module default 128; kept small per instructions)
RES = 4        # step=0 spatial resolution
HW = RES * RES
NEG_SLOPE = 0.2
EPS = 1e-8


def _leaky(x):
    return jnp.where(x > 0, x, NEG_SLOPE * x)


def discriminator_kernel(x_ref, wrgb_ref, wfused_ref, bias1_ref, e3_ref,
                         w4_ref, b4_ref, wl_ref, bl_ref, out_ref):
    x = x_ref[...]                                                   # (B, 3*HW)

    # Both x-based matmuls issued back-to-back (independent); the second MXU
    # weight push overlaps with the batch-variance VPU work below.
    h1 = jnp.dot(x, wrgb_ref[...], preferred_element_type=jnp.float32)      # (B, HW*F)  from_rgb (no bias)
    h3_pre = jnp.dot(x, wfused_ref[...], preferred_element_type=jnp.float32)  # (B, HW*F)  from_rgb∘conv1 fused

    # ---- minibatch std scalar: biased variance over batch, centered form ------
    mu = jnp.mean(h1, axis=0, keepdims=True)                         # (1, HW*F)
    d = h1 - mu
    var = jnp.mean(d * d, axis=0, keepdims=True)
    std = jnp.sqrt(var + EPS)
    m_std = jnp.mean(std, axis=1, keepdims=True)                     # (1, 1)

    # ---- progression[6] conv #1: 3x3 pad 1, (F+1)->F (weights pre-fused) ------
    h3 = _leaky(h3_pre + bias1_ref[...] + m_std * e3_ref[...])       # (B, HW*F)

    # ---- progression[6] conv #2: 4x4 pad 0, single (B,512)@(512,F) matmul -----
    h4 = _leaky(jnp.dot(h3, w4_ref[...],
                        preferred_element_type=jnp.float32) + b4_ref[...])   # (B, F)

    # ---- EqualizedLinear(F, 1): elementwise mul + lane reduction --------------
    out_ref[...] = jnp.sum(h4 * wl_ref[...], axis=-1, keepdims=True) + bl_ref[...]


def make_params(key):
    """Deterministic synthetic parameters with equalized-lr scaling baked in."""
    k = jax.random.split(key, 8)
    F = FEAT
    # from_rgb[6]: EqualizedConv2d(3, F, 1), scale = sqrt(2 / 3)
    w_rgb = jax.random.normal(k[0], (3, F), jnp.float32) * math.sqrt(2.0 / 3.0)
    b_rgb = jax.random.normal(k[1], (1, F), jnp.float32) * 0.1
    # progression[6] conv1: EqualizedConv2d(F+1, F, 3, pad=1)   [tap, c_in, c_out]
    s3 = math.sqrt(2.0 / ((F + 1) * 9))
    w3_full = jax.random.normal(k[2], (9, F + 1, F), jnp.float32) * s3
    b3 = jax.random.normal(k[3], (1, F), jnp.float32) * 0.1
    # progression[6] conv2: EqualizedConv2d(F, F, 4, pad=0)      [spatial, c_in, c_out]
    s4 = math.sqrt(2.0 / (F * HW))
    w4 = jax.random.normal(k[4], (HW, F, F), jnp.float32) * s4
    b4 = jax.random.normal(k[5], (1, F), jnp.float32) * 0.1
    # EqualizedLinear(F, 1)
    w_l = jax.random.normal(k[6], (F, 1), jnp.float32) * math.sqrt(2.0 / F)
    b_l = jax.random.normal(k[7], (1, 1), jnp.float32) * 0.1
    return w_rgb, b_rgb, w3_full, b3, w4, b4, w_l, b_l


def _conv3_neighbors():
    """For each output position p and 3x3 tap t (pad 1), the in-bounds input position, else -1."""
    nbr = -np.ones((HW, 9), np.int32)
    for ph in range(RES):
        for pw in range(RES):
            p = ph * RES + pw
            for kh in range(3):
                for kw in range(3):
                    ih, iw = ph + kh - 1, pw + kw - 1
                    if 0 <= ih < RES and 0 <= iw < RES:
                        nbr[p, kh * 3 + kw] = ih * RES + iw
    return nbr


def pack_operands(params):
    """Host-side repack (run ONCE per parameter set) into device-resident constants.

    Output activation layout: (B, HW*F) lane-dense, column index = p*F + c_out.
    Input x layout: contiguous NCHW flatten (B, 3*HW), column index = c*HW + p;
    that permutation is absorbed into the row ordering of wrgb_perm / W_fused.
    """
    w_rgb, b_rgb, w3_full, b3, w4, b4, w_l, b_l = [np.asarray(p, np.float64) for p in params]
    F = FEAT
    nbr = _conv3_neighbors()

    # from_rgb as a block matrix acting directly on x.reshape(B, 3*HW) (bias folded out).
    wrgb_perm = np.zeros((3 * HW, HW * F), np.float64)
    for p in range(HW):
        for c in range(3):
            wrgb_perm[c * HW + p, p * F:(p + 1) * F] = w_rgb[c]

    # conv #1 real-channel block matrix (HW*F, HW*F); from_rgb bias + conv bias folded
    # into a constant bias row; constant-std-channel weights folded into e3.
    w3_main = w3_full[:, :F, :]                 # (9, F, F)   real channels
    w3_std = w3_full[:, F, :]                   # (9, F)      std channel
    wbig = np.zeros((HW * F, HW * F), np.float64)
    bias1 = np.tile(b3[0], (HW, 1))
    e3 = np.zeros((HW, F), np.float64)
    for p in range(HW):
        for t in range(9):
            q = int(nbr[p, t])
            if q >= 0:
                wbig[q * F:(q + 1) * F, p * F:(p + 1) * F] = w3_main[t]
                bias1[p] += b_rgb[0] @ w3_main[t]        # fold from_rgb bias through conv1
                e3[p] += w3_std[t]

    # Fold conv#1 through from_rgb on the host: kernel never sees the 512x512 weight.
    w_fused = wrgb_perm @ wbig                           # (3*HW, HW*F)

    # conv #2 weights stacked along the contraction dim: (HW*F, F).
    w4_stack = w4.reshape(HW * F, F)

    f32 = lambda a: jnp.asarray(np.asarray(a, np.float32))
    return (f32(wrgb_perm),                 # (48, 512)
            f32(w_fused),                   # (48, 512)
            f32(bias1.reshape(1, HW * F)),  # (1, 512)
            f32(e3.reshape(1, HW * F)),     # (1, 512)
            f32(w4_stack),                  # (512, 32)
            f32(b4.reshape(1, F)),          # (1, 32)
            f32(w_l.reshape(1, F)),         # (1, 32)
            f32(b_l.reshape(1, 1)))         # (1, 1)


def discriminator_forward(x_nchw, packed):
    batch = x_nchw.shape[0]
    # Contiguous NCHW flatten (free under jit); permutation lives in the packed weights.
    x_flat = x_nchw.reshape(batch, 3 * HW)
    vmem = pl.BlockSpec(memory_space=pltpu.MemorySpace.VMEM)
    return pl.pallas_call(
        discriminator_kernel,
        out_shape=jax.ShapeDtypeStruct((batch, 1), jnp.float32),
        in_specs=[vmem] * 9,
        out_specs=vmem,
    )(x_flat, *packed)


def reference_forward(x_nchw, params):
    """Independent pure-JAX reference (XLA convs) for correctness checking."""
    w_rgb, b_rgb, w3_full, b3, w4, b4, w_l, b_l = params
    F = FEAT
    hp = jax.lax.Precision.HIGHEST
    h = jnp.einsum('bchw,cf->bfhw', x_nchw, w_rgb, precision=hp) \
        + b_rgb[0][None, :, None, None]
    std = jnp.sqrt(jnp.var(h, axis=0) + EPS)                    # biased (unbiased=False)
    m_std = jnp.mean(std)
    h = jnp.concatenate(
        [h, jnp.broadcast_to(m_std, (h.shape[0], 1, RES, RES))], axis=1)
    w3_oihw = jnp.transpose(w3_full.reshape(3, 3, F + 1, F), (3, 2, 0, 1))
    h = jax.lax.conv_general_dilated(h, w3_oihw, (1, 1), ((1, 1), (1, 1)), precision=hp)
    h = _leaky(h + b3[0][None, :, None, None])
    w4_oihw = jnp.transpose(w4.reshape(RES, RES, F, F), (3, 2, 0, 1))
    h = jax.lax.conv_general_dilated(h, w4_oihw, (1, 1), ((0, 0), (0, 0)), precision=hp)
    h = _leaky(h + b4[0][None, :, None, None])
    return jnp.dot(h[:, :, 0, 0], w_l, precision=hp) + b_l


if __name__ == "__main__":
    key = jax.random.PRNGKey(0)
    kx, kp = jax.random.split(key)
    x = jax.random.normal(kx, (B, 3, RES, RES), jnp.float32)    # NCHW, step=0 input
    params = make_params(kp)

    # Host packing hoisted out of the call path: done once, kept device-resident.
    packed = pack_operands(params)
    fwd = jax.jit(discriminator_forward)

    out = jax.block_until_ready(fwd(x, packed))
    assert out.shape == (B, 1) and out.dtype == jnp.float32

    # Second call exercises the cached (packing-free) path.
    out = jax.block_until_ready(fwd(x, packed))

    ref = jax.block_until_ready(reference_forward(x, params))
    np.testing.assert_allclose(np.asarray(out), np.asarray(ref), rtol=2e-3, atol=2e-3)
    print("KERNEL_OK")
</pallas_src>

<mosaic_0001>
module attributes {stable_mosaic.version = 11 : i64} {
  func.func @discriminator_kernel(%arg0: memref<2x48xf32, #tpu.memory_space<vmem>>, %arg1: memref<48x512xf32, #tpu.memory_space<vmem>>, %arg2: memref<48x512xf32, #tpu.memory_space<vmem>>, %arg3: memref<1x512xf32, #tpu.memory_space<vmem>>, %arg4: memref<1x512xf32, #tpu.memory_space<vmem>>, %arg5: memref<512x32xf32, #tpu.memory_space<vmem>>, %arg6: memref<1x32xf32, #tpu.memory_space<vmem>>, %arg7: memref<1x32xf32, #tpu.memory_space<vmem>>, %arg8: memref<1x1xf32, #tpu.memory_space<vmem>>, %arg9: memref<2x1xf32, #tpu.memory_space<vmem>>) attributes {dimension_semantics = [], scalar_prefetch = 0 : i64, scratch_operands = 0 : i64, tpu.core_type = #tpu.core_type<tc>} {
    %c0 = arith.constant 0 : index
    %c0_0 = arith.constant 0 : index
    %0 = vector.load %arg0[%c0, %c0_0] : memref<2x48xf32, #tpu.memory_space<vmem>>, vector<2x48xf32>
    %c0_1 = arith.constant 0 : index
    %c0_2 = arith.constant 0 : index
    %1 = vector.load %arg1[%c0_1, %c0_2] : memref<48x512xf32, #tpu.memory_space<vmem>>, vector<48x512xf32>
    %cst = arith.constant dense<0.000000e+00> : vector<2x512xf32>
    %2 = tpu.matmul %0, %1, %cst {dimension_numbers = #tpu.dot_dimension_numbers<[1], [0], [0], [1], [0, 0, 1, 1], [], []>} : vector<2x48xf32>, vector<48x512xf32>, vector<2x512xf32> -> vector<2x512xf32>
    %c0_3 = arith.constant 0 : index
    %c0_4 = arith.constant 0 : index
    %3 = vector.load %arg2[%c0_3, %c0_4] : memref<48x512xf32, #tpu.memory_space<vmem>>, vector<48x512xf32>
    %cst_5 = arith.constant dense<0.000000e+00> : vector<2x512xf32>
    %4 = tpu.matmul %0, %3, %cst_5 {dimension_numbers = #tpu.dot_dimension_numbers<[1], [0], [0], [1], [0, 0, 1, 1], [], []>} : vector<2x48xf32>, vector<48x512xf32>, vector<2x512xf32> -> vector<2x512xf32>
    %cst_6 = arith.constant dense<0.000000e+00> : vector<512xf32>
    %5 = vector.multi_reduction <add>, %2, %cst_6 [0] : vector<2x512xf32> to vector<512xf32>
    %6 = vector.shape_cast %5 : vector<512xf32> to vector<1x512xf32>
    %cst_7 = arith.constant 2.000000e+00 : f32
    %7 = vector.broadcast %cst_7 : f32 to vector<1x512xf32>
    %8 = arith.divf %6, %7 : vector<1x512xf32>
    %9 = vector.broadcast %8 : vector<1x512xf32> to vector<2x512xf32>
    %10 = arith.subf %2, %9 : vector<2x512xf32>
    %11 = arith.mulf %10, %10 : vector<2x512xf32>
    %cst_8 = arith.constant dense<0.000000e+00> : vector<512xf32>
    %12 = vector.multi_reduction <add>, %11, %cst_8 [0] : vector<2x512xf32> to vector<512xf32>
    %13 = vector.shape_cast %12 : vector<512xf32> to vector<1x512xf32>
    %cst_9 = arith.constant 2.000000e+00 : f32
    %14 = vector.broadcast %cst_9 : f32 to vector<1x512xf32>
    %15 = arith.divf %13, %14 : vector<1x512xf32>
    %cst_10 = arith.constant 9.99999993E-9 : f32
    %16 = vector.broadcast %cst_10 : f32 to vector<1x512xf32>
    %17 = arith.addf %15, %16 : vector<1x512xf32>
    %18 = math.sqrt %17 : vector<1x512xf32>
    %cst_11 = arith.constant dense<0.000000e+00> : vector<1xf32>
    %19 = vector.multi_reduction <add>, %18, %cst_11 [1] : vector<1x512xf32> to vector<1xf32>
    %20 = vector.shape_cast %19 : vector<1xf32> to vector<1x1xf32>
    %cst_12 = arith.constant 5.120000e+02 : f32
    %21 = vector.broadcast %cst_12 : f32 to vector<1x1xf32>
    %22 = arith.divf %20, %21 : vector<1x1xf32>
    %c0_13 = arith.constant 0 : index
    %c0_14 = arith.constant 0 : index
    %23 = vector.load %arg3[%c0_13, %c0_14] : memref<1x512xf32, #tpu.memory_space<vmem>>, vector<1x512xf32>
    %24 = vector.broadcast %23 : vector<1x512xf32> to vector<2x512xf32>
    %25 = arith.addf %4, %24 : vector<2x512xf32>
    %c0_15 = arith.constant 0 : index
    %c0_16 = arith.constant 0 : index
    %26 = vector.load %arg4[%c0_15, %c0_16] : memref<1x512xf32, #tpu.memory_space<vmem>>, vector<1x512xf32>
    %27 = vector.broadcast %22 : vector<1x1xf32> to vector<1x512xf32>
    %28 = arith.mulf %27, %26 : vector<1x512xf32>
    %29 = vector.broadcast %28 : vector<1x512xf32> to vector<2x512xf32>
    %30 = arith.addf %25, %29 : vector<2x512xf32>
    %cst_17 = arith.constant 0.000000e+00 : f32
    %31 = vector.broadcast %cst_17 : f32 to vector<2x512xf32>
    %32 = arith.cmpf ogt, %30, %31 : vector<2x512xf32>
    %cst_18 = arith.constant 2.000000e-01 : f32
    %33 = vector.broadcast %cst_18 : f32 to vector<2x512xf32>
    %34 = arith.mulf %33, %30 : vector<2x512xf32>
    %35 = arith.select %32, %30, %34 : vector<2x512xi1>, vector<2x512xf32>
    %c0_19 = arith.constant 0 : index
    %c0_20 = arith.constant 0 : index
    %36 = vector.load %arg5[%c0_19, %c0_20] : memref<512x32xf32, #tpu.memory_space<vmem>>, vector<512x32xf32>
    %cst_21 = arith.constant dense<0.000000e+00> : vector<2x32xf32>
    %37 = tpu.matmul %35, %36, %cst_21 {dimension_numbers = #tpu.dot_dimension_numbers<[1], [0], [0], [1], [0, 0, 1, 1], [], []>} : vector<2x512xf32>, vector<512x32xf32>, vector<2x32xf32> -> vector<2x32xf32>
    %c0_22 = arith.constant 0 : index
    %c0_23 = arith.constant 0 : index
    %38 = vector.load %arg6[%c0_22, %c0_23] : memref<1x32xf32, #tpu.memory_space<vmem>>, vector<1x32xf32>
    %39 = vector.broadcast %38 : vector<1x32xf32> to vector<2x32xf32>
    %40 = arith.addf %37, %39 : vector<2x32xf32>
    %cst_24 = arith.constant 0.000000e+00 : f32
    %41 = vector.broadcast %cst_24 : f32 to vector<2x32xf32>
    %42 = arith.cmpf ogt, %40, %41 : vector<2x32xf32>
    %cst_25 = arith.constant 2.000000e-01 : f32
    %43 = vector.broadcast %cst_25 : f32 to vector<2x32xf32>
    %44 = arith.mulf %43, %40 : vector<2x32xf32>
    %45 = arith.select %42, %40, %44 : vector<2x32xi1>, vector<2x32xf32>
    %c0_26 = arith.constant 0 : index
    %c0_27 = arith.constant 0 : index
    %46 = vector.load %arg7[%c0_26, %c0_27] : memref<1x32xf32, #tpu.memory_space<vmem>>, vector<1x32xf32>
    %47 = vector.broadcast %46 : vector<1x32xf32> to vector<2x32xf32>
    %48 = arith.mulf %45, %47 : vector<2x32xf32>
    %cst_28 = arith.constant dense<0.000000e+00> : vector<2xf32>
    %49 = vector.multi_reduction <add>, %48, %cst_28 [1] : vector<2x32xf32> to vector<2xf32>
    %50 = vector.shape_cast %49 : vector<2xf32> to vector<2x1xf32>
    %c0_29 = arith.constant 0 : index
    %c0_30 = arith.constant 0 : index
    %51 = vector.load %arg8[%c0_29, %c0_30] : memref<1x1xf32, #tpu.memory_space<vmem>>, vector<1x1xf32>
    %52 = vector.broadcast %51 : vector<1x1xf32> to vector<2x1xf32>
    %53 = arith.addf %50, %52 : vector<2x1xf32>
    %c0_31 = arith.constant 0 : index
    %c0_32 = arith.constant 0 : index
    %54 = vector.load %arg9[%c0_31, %c0_32] : memref<2x1xf32, #tpu.memory_space<vmem>>, vector<2x1xf32>
    tpu.vector_store %arg9[%c0_31, %c0_32], %53 {strides = array<i32>} : memref<2x1xf32, #tpu.memory_space<vmem>>, vector<2x1xf32>,
    return
  }
}

</mosaic_0001>

<bundles_post_ra>
// kernel: discriminator_forward.1
= control target key start
LH: loop header
LB: loop body
LE: loop exit
PB: predicated region body
PF: predicated region fallthrough
CT: control target
= control target key end

     0   :  { %v983_v3 = vmov 0.0   ;;  %vm59_vm0 = vcmask 392192   ;;  %vm229_vm1 = vcmask 1041408   ;;  %vm767_vm15 = vcmask 254976   ;;  %s1407_s1 = inlined_call_operand.vmem [shape: f32[48,512], index: 1, kind: input, shape index: {}]   ;;  %s1408_s2 = inlined_call_operand.vmem [shape: f32[48,512], index: 2, kind: input, shape index: {}]   ;;  %s1409_s0 = inlined_call_operand.vmem [shape: f32[2,48], index: 0, kind: input, shape index: {}]   ;;  %s1410_s5 = inlined_call_operand.vmem [shape: f32[512,32], index: 5, kind: input, shape index: {}]   ;;  %s1411_s3 = inlined_call_operand.vmem [shape: f32[1,512], index: 3, kind: input, shape index: {}]   ;;  %s1412_s4 = inlined_call_operand.vmem [shape: f32[1,512], index: 4, kind: input, shape index: {}]   ;;  %s1413_s8 = inlined_call_operand.<no memory space> [shape: f32[1,1], index: 8, kind: input, shape index: {}]   ;;  %s1414_s6 = inlined_call_operand.vmem [shape: f32[1,32], index: 6, kind: input, shape index: {}]   ;;  %s1415_s7 = inlined_call_operand.vmem [shape: f32[1,32], index: 7, kind: input, shape index: {}]   ;;  %s1416_s9 = inlined_call_operand.vmem [shape: f32[2,1], index: 9, kind: output, shape index: {}]  }
   0x1   :  { %v36_v0 = vld [vmem:[%s1407_s1 + $0x8] sm:$0xff]  ;;  %v38_v2 = vld [vmem:[%s1407_s1 + $0x18] sm:$0xff]  ;;  %127 = vmatprep.mubr.f32.mxu0 %v983_v3  ;;  %198 = vmatprep.mubr.f32.mxu1 %v983_v3  ;;  %v35_v6 = vld [vmem:[%s1407_s1] sm:$0xff] }
   0x2   :  { %v40_v1 = vld [vmem:[%s1407_s1 + $0x28] sm:$0xff]  ;;  %v42_v5 = vld [vmem:[%s1407_s1 + $0x38] sm:$0xff]  ;;  %v39_v7 = vld [vmem:[%s1407_s1 + $0x20] sm:$0xff] }
   0x3   :  { %v862_v4 = vpack.c.bf16 %v40_v1, %v36_v0  ;;  %v874_v8 = vpack.c.bf16 %v42_v5, %v38_v2  ;;  %v864_v9 = vpack.c.bf16 %v39_v7, %v35_v6  ;;  %v37_v10 = vld [vmem:[%s1407_s1 + $0x10] sm:$0xff]  ;;  %v44_v12 = vld [vmem:[%s1407_s1 + $0x48] sm:$0xff]  ;;  %v46_v15 = vld [vmem:[%s1407_s1 + $0x58] sm:$0xff] }
   0x4   :  { %v41_v11 = vld [vmem:[%s1407_s1 + $0x30] sm:$0xff]  ;;  %v48_v14 = vld [vmem:[%s1407_s1 + $0x68] sm:$0xff]  ;;  %v50_v16 = vld [vmem:[%s1407_s1 + $0x78] sm:$0xff] }
   0x5   :  { %863 = vmatprep.subr.bf16.mxu0 %v862_v4  ;;  %v876_v13 = vpack.c.bf16 %v41_v11, %v37_v10  ;;  %875 = vmatprep.subr.bf16.mxu1 %v874_v8  ;;  %v866_v17 = vpack.c.bf16 %v48_v14, %v44_v12  ;;  %v878_v18 = vpack.c.bf16 %v50_v16, %v46_v15  ;;  %v43_v19 = vld [vmem:[%s1407_s1 + $0x40] sm:$0xff]  ;;  %v45_v21 = vld [vmem:[%s1407_s1 + $0x50] sm:$0xff]  ;;  %v52_v24 = vld [vmem:[%s1407_s1 + $0x88] sm:$0xff] }
   0x6   :  { %865 = vmatpush1.bf16.msra.mxu0 %v864_v9  ;;  %v47_v20 = vld [vmem:[%s1407_s1 + $0x60] sm:$0xff]  ;;  %v49_v23 = vld [vmem:[%s1407_s1 + $0x70] sm:$0xff]  ;;  %v56_v25 = vld [vmem:[%s1407_s1 + $0xa8] sm:$0xff] }
   0x7   :  { %877 = vmatpush1.bf16.msra.mxu1 %v876_v13  ;;  %v868_v22 = vpack.c.bf16 %v47_v20, %v43_v19  ;;  %867 = vmatprep.subr.bf16.mxu0 %v866_v17  ;;  %v880_v26 = vpack.c.bf16 %v49_v23, %v45_v21  ;;  %v870_v27 = vpack.c.bf16 %v56_v25, %v52_v24  ;;  %v54_v28 = vld [vmem:[%s1407_s1 + $0x98] sm:$0xff]  ;;  %v51_v30 = vld [vmem:[%s1407_s1 + $0x80] sm:$0xff]  ;;  %v53_v33 = vld [vmem:[%s1407_s1 + $0x90] sm:$0xff] }
   0x8   :  { %879 = vmatprep.subr.bf16.mxu1 %v878_v18  ;;  %v58_v29 = vld [vmem:[%s1407_s1 + $0xb8] sm:$0xff]  ;;  %v55_v32 = vld [vmem:[%s1407_s1 + $0xa0] sm:$0xff]  ;;  %v57_v34 = vld [vmem:[%s1407_s1 + $0xb0] sm:$0xff] }
   0x9   :  { %v882_v31 = vpack.c.bf16 %v58_v29, %v54_v28  ;;  %v872_v35 = vpack.c.bf16 %v55_v32, %v51_v30  ;;  %v206_v36 = vld [vmem:[%s1408_s2 + $0x8] sm:$0xff]  ;;  %v884_v38 = vpack.c.bf16 %v57_v34, %v53_v33  ;;  %v205_v40 = vld [vmem:[%s1408_s2] sm:$0xff]  ;;  %v208_v42 = vld [vmem:[%s1408_s2 + $0x18] sm:$0xff] }
   0xa   :  { %869 = vmatpush1.bf16.msra.mxu0 %v868_v22  ;;  %v210_v37 = vld [vmem:[%s1408_s2 + $0x28] sm:$0xff]  ;;  %v209_v41 = vld [vmem:[%s1408_s2 + $0x20] sm:$0xff]  ;;  %v212_v43 = vld [vmem:[%s1408_s2 + $0x38] sm:$0xff] }
   0xb   :  { %881 = vmatpush1.bf16.msra.mxu1 %v880_v26  ;;  %871 = vmatprep.subr.bf16.mxu0 %v870_v27  ;;  %v886_v39 = vpack.c.bf16 %v210_v37, %v206_v36  ;;  %v207_v44 = vld [vmem:[%s1408_s2 + $0x10] sm:$0xff]  ;;  %v898_v46 = vpack.c.bf16 %v212_v43, %v208_v42  ;;  %v214_v47 = vld [vmem:[%s1408_s2 + $0x48] sm:$0xff]  ;;  %v34_v49 = vld [vmem:[%s1409_s0] sm:$0x3]  ;;  %v888_v50 = vpack.c.bf16 %v209_v41, %v205_v40 }
   0xc   :  { %883 = vmatprep.subr.bf16.mxu1 %v882_v31  ;;  %v211_v45 = vld [vmem:[%s1408_s2 + $0x30] sm:$0xff]  ;;  %v218_v48 = vld [vmem:[%s1408_s2 + $0x68] sm:$0xff]  ;;  %v216_v51 = vld [vmem:[%s1408_s2 + $0x58] sm:$0xff] }
   0xd   :  { %v220_v52 = vld [vmem:[%s1408_s2 + $0x78] sm:$0xff]  ;;  %v900_v53 = vpack.c.bf16 %v211_v45, %v207_v44  ;;  %v890_v54 = vpack.c.bf16 %v218_v48, %v214_v47  ;;  %v213_v55 = vld [vmem:[%s1408_s2 + $0x40] sm:$0xff]  ;;  %v215_v57 = vld [vmem:[%s1408_s2 + $0x50] sm:$0xff] }
   0xe   :  { %873 = vmatpush1.bf16.msra.mxu0 %v872_v35  ;;  %v217_v56 = vld [vmem:[%s1408_s2 + $0x60] sm:$0xff]  ;;  %v902_v58 = vpack.c.bf16 %v220_v52, %v216_v51  ;;  %v219_v59 = vld [vmem:[%s1408_s2 + $0x70] sm:$0xff]  ;;  %v222_v60 = vld [vmem:[%s1408_s2 + $0x88] sm:$0xff] }
   0xf   :  { %885 = vmatpush1.bf16.msra.mxu1 %v884_v38  ;;  %887 = vmatprep.subr.bf16.mxu0 %v886_v39  ;;  %v226_v61 = vld [vmem:[%s1408_s2 + $0xa8] sm:$0xff]  ;;  %v224_v62 = vld [vmem:[%s1408_s2 + $0x98] sm:$0xff]  ;;  %v892_v0 = vpack.c.bf16 %v217_v56, %v213_v55  ;;  %v904_v1 = vpack.c.bf16 %v219_v59, %v215_v57  ;;  %v221_v4 = vld [vmem:[%s1408_s2 + $0x80] sm:$0xff] }
  0x10   :  { %899 = vmatprep.subr.bf16.mxu1 %v898_v46  ;;  %v228_v63 = vld [vmem:[%s1408_s2 + $0xb8] sm:$0xff]  ;;  %v894_v2 = vpack.c.bf16 %v226_v61, %v222_v60  ;;  %v225_v5 = vld [vmem:[%s1408_s2 + $0xa0] sm:$0xff]  ;;  %v223_v7 = vld [vmem:[%s1408_s2 + $0x90] sm:$0xff] }
  0x11   :  { %785 = vmatmul.mubr.msk.f32.vlgmr.msra.gmra.mrb[0].mxu0 %vm59_vm0, %v34_v49  ;;  %v906_v6 = vpack.c.bf16 %v228_v63, %v224_v62  ;;  %v227_v8 = vld [vmem:[%s1408_s2 + $0xb0] sm:$0xff]  ;;  %v896_v9 = vpack.c.bf16 %v225_v5, %v221_v4  ;;  %v561_v11 = vld [vmem:[%s1410_s5 + $0x80] sm:$0xff]  ;;  %v594_v14 = vld [vmem:[%s1410_s5 + $0x188] sm:$0xff] }
  0x12   :  { %786 = vmatmul.mubr.msk.f32.vlgmr.msra.gmra.mrb[0].mxu1 %vm59_vm0, %v34_v49  ;;  %889 = vmatpush1.bf16.msra.mxu0 %v888_v50  ;;  %v908_v10 = vpack.c.bf16 %v227_v8, %v223_v7  ;;  %v593_v12 = vld [vmem:[%s1410_s5 + $0x180] sm:$0xff]  ;;  %v546_v16 = vld [vmem:[%s1410_s5 + $0x8] sm:$0xff]  ;;  %v563_v21 = vld [vmem:[%s1410_s5 + $0x90] sm:$0xff] }
  0x13   :  { %901 = vmatpush1.bf16.msra.mxu1 %v900_v53  ;;  %891 = vmatprep.subr.bf16.mxu0 %v890_v54  ;;  %v545_v15 = vld [vmem:[%s1410_s5] sm:$0xff]  ;;  %v942_v17 = vpack.c.bf16 %v594_v14, %v593_v12  ;;  %v578_v20 = vld [vmem:[%s1410_s5 + $0x108] sm:$0xff]  ;;  %v564_v23 = vld [vmem:[%s1410_s5 + $0x98] sm:$0xff] }
  0x14   :  { %903 = vmatprep.subr.bf16.mxu1 %v902_v58  ;;  %428 = vmatprep.mubr.f32.mxu0 %v983_v3  ;;  %v912_v18 = vpack.c.bf16 %v546_v16, %v545_v15  ;;  %v577_v19 = vld [vmem:[%s1410_s5 + $0x100] sm:$0xff]  ;;  %v595_v24 = vld [vmem:[%s1410_s5 + $0x190] sm:$0xff]  ;;  %v596_v25 = vld [vmem:[%s1410_s5 + $0x198] sm:$0xff]  ;;  %v914_v26 = vpack.c.bf16 %v564_v23, %v563_v21 }
  0x15   :  { %499 = vmatprep.mubr.f32.mxu1 %v983_v3  ;;  %v562_v3 = vld [vmem:[%s1410_s5 + $0x88] sm:$0xff]  ;;  %v944_v22 = vpack.c.bf16 %v578_v20, %v577_v19  ;;  %v946_v27 = vpack.c.bf16 %v596_v25, %v595_v24  ;;  %v547_v28 = vld [vmem:[%s1410_s5 + $0x10] sm:$0xff]  ;;  %v548_v29 = vld [vmem:[%s1410_s5 + $0x18] sm:$0xff] }
  0x16   :  { %893 = vmatpush1.bf16.msra.mxu0 %v892_v0  ;;  %v910_v13 = vpack.c.bf16 %v562_v3, %v561_v11  ;;  %v579_v30 = vld [vmem:[%s1410_s5 + $0x110] sm:$0xff]  ;;  %v916_v31 = vpack.c.bf16 %v548_v29, %v547_v28  ;;  %v580_v32 = vld [vmem:[%s1410_s5 + $0x118] sm:$0xff]  ;;  %v565_v33 = vld [vmem:[%s1410_s5 + $0xa0] sm:$0xff] }
  0x17   :  { %905 = vmatpush1.bf16.msra.mxu1 %v904_v1  ;;  %895 = vmatprep.subr.bf16.mxu0 %v894_v2  ;;  %v566_v34 = vld [vmem:[%s1410_s5 + $0xa8] sm:$0xff]  ;;  %v948_v35 = vpack.c.bf16 %v580_v32, %v579_v30  ;;  %v597_v37 = vld [vmem:[%s1410_s5 + $0x1a0] sm:$0xff]  ;;  %v567_v45 = vld [vmem:[%s1410_s5 + $0xb0] sm:$0xff] }
  0x18   :  { %907 = vmatprep.subr.bf16.mxu1 %v906_v6  ;;  %v918_v36 = vpack.c.bf16 %v566_v34, %v565_v33  ;;  %v598_v38 = vld [vmem:[%s1410_s5 + $0x1a8] sm:$0xff]  ;;  %v549_v39 = vld [vmem:[%s1410_s5 + $0x20] sm:$0xff]  ;;  %v568_v46 = vld [vmem:[%s1410_s5 + $0xb8] sm:$0xff] }
  0x19   :  { %v950_v40 = vpack.c.bf16 %v598_v38, %v597_v37  ;;  %v550_v41 = vld [vmem:[%s1410_s5 + $0x28] sm:$0xff]  ;;  %v581_v42 = vld [vmem:[%s1410_s5 + $0x120] sm:$0xff]  ;;  %v599_v47 = vld [vmem:[%s1410_s5 + $0x1b0] sm:$0xff] }
  0x1a   :  { %897 = vmatpush1.bf16.msra.mxu0 %v896_v9  ;;  %v582_v43 = vld [vmem:[%s1410_s5 + $0x128] sm:$0xff]  ;;  %v920_v44 = vpack.c.bf16 %v550_v41, %v549_v39  ;;  %v600_v50 = vld [vmem:[%s1410_s5 + $0x1b8] sm:$0xff]  ;;  %v551_v51 = vld [vmem:[%s1410_s5 + $0x30] sm:$0xff] }
  0x1b   :  { %909 = vmatpush1.bf16.msra.mxu1 %v908_v10  ;;  %911 = vmatprep.subr.bf16.mxu0 %v910_v13  ;;  %v952_v48 = vpack.c.bf16 %v582_v43, %v581_v42  ;;  %v552_v52 = vld [vmem:[%s1410_s5 + $0x38] sm:$0xff]  ;;  %v954_v53 = vpack.c.bf16 %v600_v50, %v599_v47  ;;  %v583_v54 = vld [vmem:[%s1410_s5 + $0x130] sm:$0xff]  ;;  %v569_v56 = vld [vmem:[%s1410_s5 + $0xc0] sm:$0xff] }
  0x1c   :  { %943 = vmatprep.subr.bf16.mxu1 %v942_v17  ;;  %v584_v55 = vld [vmem:[%s1410_s5 + $0x138] sm:$0xff]  ;;  %v570_v57 = vld [vmem:[%s1410_s5 + $0xc8] sm:$0xff]  ;;  %v601_v58 = vld [vmem:[%s1410_s5 + $0x1c0] sm:$0xff]  ;;  %v924_v60 = vpack.c.bf16 %v552_v52, %v551_v51 }
  0x1d   :  { %787 = vmatmul.mubr.msk.f32.vlgmr.msra.gmra.mrb[2].mxu0 %vm59_vm0, %v34_v49  ;;  %v602_v59 = vld [vmem:[%s1410_s5 + $0x1c8] sm:$0xff]  ;;  %v956_v61 = vpack.c.bf16 %v584_v55, %v583_v54  ;;  %v926_v62 = vpack.c.bf16 %v570_v57, %v569_v56  ;;  %v553_v63 = vld [vmem:[%s1410_s5 + $0x40] sm:$0xff] }
  0x1e   :  { %788 = vmatmul.mubr.msk.f32.vlgmr.msra.gmra.mrb[2].mxu1 %vm59_vm0, %v34_v49  ;;  %913 = vmatpush3.bf16.msra.mxu0 %v912_v18  ;;  %v922_v49 = vpack.c.bf16 %v568_v46, %v567_v45  ;;  %v554_v0 = vld [vmem:[%s1410_s5 + $0x48] sm:$0xff]  ;;  %v958_v1 = vpack.c.bf16 %v602_v59, %v601_v58  ;;  %v585_v2 = vld [vmem:[%s1410_s5 + $0x140] sm:$0xff]  ;;  %vm779_vm0 = vcmask 1024  }
  0x1f   :  { %945 = vmatpush3.bf16.msra.mxu1 %v944_v22  ;;  %915 = vmatprep.subr.bf16.mxu0 %v914_v26  ;;  %v586_v4 = vld [vmem:[%s1410_s5 + $0x148] sm:$0xff]  ;;  %v928_v5 = vpack.c.bf16 %v554_v0, %v553_v63 }
  0x20   :  { %947 = vmatprep.subr.bf16.mxu1 %v946_v27  ;;  %v960_v6 = vpack.c.bf16 %v586_v4, %v585_v2 }
  0x22   :  { %917 = vmatpush3.bf16.msra.mxu0 %v916_v31 }
  0x23   :  { %949 = vmatpush3.bf16.msra.mxu1 %v948_v35  ;;  %919 = vmatprep.subr.bf16.mxu0 %v918_v36 }
  0x24   :  { %951 = vmatprep.subr.bf16.mxu1 %v950_v40 }
  0x26   :  { %921 = vmatpush3.bf16.msra.mxu0 %v920_v44 }
  0x27   :  { %953 = vmatpush3.bf16.msra.mxu1 %v952_v48  ;;  %923 = vmatprep.subr.bf16.mxu0 %v922_v49 }
  0x28   :  { %955 = vmatprep.subr.bf16.mxu1 %v954_v53 }
  0x2a   :  { %925 = vmatpush3.bf16.msra.mxu0 %v924_v60 }
  0x2b   :  { %957 = vmatpush3.bf16.msra.mxu1 %v956_v61  ;;  %927 = vmatprep.subr.bf16.mxu0 %v926_v62 }
  0x2c   :  { %959 = vmatprep.subr.bf16.mxu1 %v958_v1 }
  0x2e   :  { %929 = vmatpush3.bf16.msra.mxu0 %v928_v5 }
  0x2f   :  { %961 = vmatpush3.bf16.msra.mxu1 %v960_v6 }
  0xe4   :  { %v129_v7 = vpop.f32.mrb[0].mxu0 }
  0xe5   :  { %v230_v8 = vsel %vm229_vm1, %v129_v7, 0.0  ;;  %v200_v9 = vpop.f32.mrb[0].mxu1  ;;  %v131_v10 = vpop.f32.mrb[1].mxu0 }
  0xe6   :  { %v231_v11 = vrot.slane %v230_v8, 4  ;;  %v244_v3 = vsel %vm229_vm1, %v200_v9, 0.0  ;;  %v237_v12 = vsel %vm229_vm1, %v131_v10, 0.0  ;;  %v202_v13 = vpop.f32.mrb[1].mxu1 }
  0xe7   :  { %v245_v14 = vrot.slane %v244_v3, 4  ;;  %v238_v15 = vrot.slane %v237_v12, 4  ;;  %v251_v16 = vsel %vm229_vm1, %v202_v13, 0.0 }
  0xe8   :  { %v232_v17 = vadd.f32 %v231_v11, %v230_v8  ;;  %v252_v18 = vrot.slane %v251_v16, 4 }
  0xe9   :  { %v246_v19 = vadd.f32 %v245_v14, %v244_v3  ;;  %v239_v20 = vadd.f32 %v238_v15, %v237_v12 }
  0xea   :  { %v233_v21 = vrot.slane %v232_v17, 2  ;;  %v253_v22 = vadd.f32 %v252_v18, %v251_v16 }
  0xeb   :  { %v247_v23 = vrot.slane %v246_v19, 2  ;;  %v240_v24 = vrot.slane %v239_v20, 2 }
  0xec   :  { %v234_v25 = vadd.f32 %v233_v21, %v232_v17  ;;  %v254_v26 = vrot.slane %v253_v22, 2 }
  0xed   :  { %v248_v27 = vadd.f32 %v247_v23, %v246_v19  ;;  %v241_v28 = vadd.f32 %v240_v24, %v239_v20 }
  0xee   :  { %v235_v29 = vrot.slane %v234_v25, 1  ;;  %v255_v30 = vadd.f32 %v254_v26, %v253_v22 }
  0xef   :  { %v249_v31 = vrot.slane %v248_v27, 1  ;;  %v242_v32 = vrot.slane %v241_v28, 1 }
  0xf0   :  { %v236_v33 = vadd.f32 %v235_v29, %v234_v25  ;;  %v256_v34 = vrot.slane %v255_v30, 1 }
  0xf1   :  { %v250_v35 = vadd.f32 %v249_v31, %v248_v27  ;;  %v243_v36 = vadd.f32 %v242_v32, %v241_v28 }
  0xf2   :  { %v259_v37 = vmul.f32 0.5, %v236_v33  ;;  %v257_v38 = vadd.f32 %v256_v34, %v255_v30 }
  0xf3   :  { %v261_v39 = vmul.f32 0.5, %v250_v35  ;;  %v260_v40 = vmul.f32 0.5, %v243_v36 }
  0xf4   :  { %v263_v41 = vsub.f32 %v129_v7, %v259_v37  ;;  %v262_v42 = vmul.f32 0.5, %v257_v38 }
  0xf5   :  { %v265_v43 = vsub.f32 %v200_v9, %v261_v39  ;;  %v264_v44 = vsub.f32 %v131_v10, %v260_v40 }
  0xf6   :  { %v267_v45 = vmul.f32 %v263_v41, %v263_v41  ;;  %v266_v46 = vsub.f32 %v202_v13, %v262_v42 }
  0xf7   :  { %v269_v47 = vmul.f32 %v265_v43, %v265_v43  ;;  %v268_v48 = vmul.f32 %v264_v44, %v264_v44 }
  0xf8   :  { %v271_v49 = vsel %vm229_vm1, %v267_v45, 0.0  ;;  %v270_v50 = vmul.f32 %v266_v46, %v266_v46  ;;  %v571_v45 = vld [vmem:[%s1410_s5 + $0xd0] sm:$0xff]  ;;  %v572_v46 = vld [vmem:[%s1410_s5 + $0xd8] sm:$0xff] }
  0xf9   :  { %v272_v51 = vrot.slane %v271_v49, 4  ;;  %v285_v52 = vsel %vm229_vm1, %v269_v47, 0.0  ;;  %v278_v53 = vsel %vm229_vm1, %v268_v48, 0.0  ;;  %v603_v47 = vld [vmem:[%s1410_s5 + $0x1d0] sm:$0xff]  ;;  %v930_v48 = vpack.c.bf16 %v572_v46, %v571_v45 }
  0xfa   :  { %v286_v54 = vrot.slane %v285_v52, 4  ;;  %v279_v55 = vrot.slane %v278_v53, 4  ;;  %v292_v56 = vsel %vm229_vm1, %v270_v50, 0.0  ;;  %v555_v50 = vld [vmem:[%s1410_s5 + $0x50] sm:$0xff] }
  0xfb   :  { %v273_v57 = vadd.f32 %v272_v51, %v271_v49  ;;  %v293_v58 = vrot.slane %v292_v56, 4  ;;  %v604_v49 = vld [vmem:[%s1410_s5 + $0x1d8] sm:$0xff]  ;;  %931 = vmatprep.subr.bf16.mxu0 %v930_v48 }
  0xfc   :  { %v287_v59 = vadd.f32 %v286_v54, %v285_v52  ;;  %v280_v60 = vadd.f32 %v279_v55, %v278_v53  ;;  %v556_v51 = vld [vmem:[%s1410_s5 + $0x58] sm:$0xff]  ;;  %v962_v52 = vpack.c.bf16 %v604_v49, %v603_v47  ;;  %v430_v53 = vpop.f32.mrb[2].mxu0  ;;  %v587_v55 = vld [vmem:[%s1410_s5 + $0x150] sm:$0xff] }
  0xfd   :  { %v274_v61 = vrot.slane %v273_v57, 2  ;;  %v294_v62 = vadd.f32 %v293_v58, %v292_v56  ;;  %v932_v54 = vpack.c.bf16 %v556_v51, %v555_v50  ;;  %v588_v56 = vld [vmem:[%s1410_s5 + $0x158] sm:$0xff]  ;;  %v573_v58 = vld [vmem:[%s1410_s5 + $0xe0] sm:$0xff] }
  0xfe   :  { %v288_v63 = vrot.slane %v287_v59, 2  ;;  %v281_v0 = vrot.slane %v280_v60, 2  ;;  %963 = vmatprep.subr.bf16.mxu1 %v962_v52 }
  0xff   :  { %v275_v1 = vadd.f32 %v274_v61, %v273_v57  ;;  %v295_v2 = vrot.slane %v294_v62, 2  ;;  %v964_v57 = vpack.c.bf16 %v588_v56, %v587_v55  ;;  %933 = vmatpush3.bf16.msra.mxu0 %v932_v54  ;;  %v432_v61 = vpop.f32.mrb[3].mxu0  ;;  %v14_v56 = vstv %s1413_s8 }
 0x100   :  { %v289_v4 = vadd.f32 %v288_v63, %v287_v59  ;;  %v282_v5 = vadd.f32 %v281_v0, %v280_v60  ;;  %v574_v59 = vld [vmem:[%s1410_s5 + $0xe8] sm:$0xff]  ;;  %v605_v60 = vld [vmem:[%s1410_s5 + $0x1e0] sm:$0xff]  ;;  %15 = vst [vmem:[#allocation2] sm:$0x1] %v14_v56 }
 0x101   :  { %v276_v6 = vrot.slane %v275_v1, 1  ;;  %v296_v7 = vadd.f32 %v295_v2, %v294_v62  ;;  %965 = vmatpush3.bf16.msra.mxu1 %v964_v57  ;;  %v501_v62 = vpop.f32.mrb[2].mxu1  ;;  %v934_v63 = vpack.c.bf16 %v574_v59, %v573_v58  ;;  %v606_v0 = vld [vmem:[%s1410_s5 + $0x1e8] sm:$0xff]  ;;  %v789_v59 = vld [vmem:[%s1414_s6] ss:$0 sm:$0xff] }
 0x102   :  { %v290_v8 = vrot.slane %v289_v4, 1  ;;  %v283_v9 = vrot.slane %v282_v5, 1  ;;  %v558_v2 = vld [vmem:[%s1410_s5 + $0x68] sm:$0xff] }
 0x103   :  { %v277_v10 = vadd.f32 %v276_v6, %v275_v1  ;;  %v297_v11 = vrot.slane %v296_v7, 1  ;;  %v557_v1 = vld [vmem:[%s1410_s5 + $0x60] sm:$0xff]  ;;  %935 = vmatprep.subr.bf16.mxu0 %v934_v63 }
 0x104   :  { %v291_v3 = vadd.f32 %v290_v8, %v289_v4  ;;  %v284_v12 = vadd.f32 %v283_v9, %v282_v5  ;;  %v503_v4 = vpop.f32.mrb[3].mxu1  ;;  %v966_v5 = vpack.c.bf16 %v606_v0, %v605_v60  ;;  %v936_v6 = vpack.c.bf16 %v558_v2, %v557_v1  ;;  %v590_v8 = vld [vmem:[%s1410_s5 + $0x168] sm:$0xff] }
 0x105   :  { %v299_v13 = vmul.f32 0.5, %v277_v10  ;;  %v298_v14 = vadd.f32 %v297_v11, %v296_v7  ;;  %v589_v7 = vld [vmem:[%s1410_s5 + $0x160] sm:$0xff]  ;;  %v575_v10 = vld [vmem:[%s1410_s5 + $0xf0] sm:$0xff]  ;;  %v576_v11 = vld [vmem:[%s1410_s5 + $0xf8] sm:$0xff] }
 0x106   :  { %v301_v15 = vmul.f32 0.5, %v291_v3  ;;  %v300_v16 = vmul.f32 0.5, %v284_v12  ;;  %v968_v9 = vpack.c.bf16 %v590_v8, %v589_v7  ;;  %967 = vmatprep.subr.bf16.mxu1 %v966_v5  ;;  %937 = vmatpush3.bf16.msra.mxu0 %v936_v6  ;;  %v607_v3 = vld [vmem:[%s1410_s5 + $0x1f0] sm:$0xff]  ;;  %v938_v12 = vpack.c.bf16 %v576_v11, %v575_v10 }
 0x107   :  { %v303_v17 = vadd.f32 1e-08, %v299_v13  ;;  %v302_v18 = vmul.f32 0.5, %v298_v14  ;;  %v608_v13 = vld [vmem:[%s1410_s5 + $0x1f8] sm:$0xff]  ;;  %v559_v14 = vld [vmem:[%s1410_s5 + $0x70] sm:$0xff] }
 0x108   :  { %v305_v19 = vadd.f32 1e-08, %v301_v15  ;;  %v304_v20 = vadd.f32 1e-08, %v300_v16  ;;  %969 = vmatpush3.bf16.msra.mxu1 %v968_v9  ;;  %v560_v15 = vld [vmem:[%s1410_s5 + $0x78] sm:$0xff]  ;;  %v970_v16 = vpack.c.bf16 %v608_v13, %v607_v3  ;;  %939 = vmatprep.subr.bf16.mxu0 %v938_v12 }
 0x109   :  { %v306_v21 = vadd.f32 1e-08, %v302_v18  ;;  %975 = vrsqrt.f32 %v303_v17  ;;  %vm309_vm2 = vcmp.eq.f32.partialorder %v303_v17, inf  ;;  %vm311_vm3 = vcmp.eq.f32.partialorder %v303_v17, 0.0  ;;  %v591_v18 = vld [vmem:[%s1410_s5 + $0x170] sm:$0xff] }
 0x10a   :  { %977 = vrsqrt.f32 %v304_v20  ;;  %v312_v26 = vand.u32 2147483648, %v303_v17  ;;  %vm316_vm4 = vcmp.eq.f32.partialorder %v304_v20, inf  ;;  %vm318_vm5 = vcmp.eq.f32.partialorder %v304_v20, 0.0  ;;  %971 = vmatprep.subr.bf16.mxu1 %v970_v16  ;;  %v791_v8 = vld [vmem:[#allocation2] ss:$0 sm:$0xff] }
 0x10b   :  { %979 = vrsqrt.f32 %v305_v19  ;;  %v319_v30 = vand.u32 2147483648, %v304_v20  ;;  %vm323_vm6 = vcmp.eq.f32.partialorder %v305_v19, inf  ;;  %v326_v37 = vand.u32 2147483648, %v305_v19 }
 0x10c   :  { %981 = vrsqrt.f32 %v306_v21  ;;  %vm330_vm7 = vcmp.eq.f32.partialorder %v306_v21, inf  ;;  %vm325_vm8 = vcmp.eq.f32.partialorder %v305_v19, 0.0  ;;  %v333_v41 = vand.u32 2147483648, %v306_v21 }
 0x10d   :  { %vm332_vm9 = vcmp.eq.f32.partialorder %v306_v21, 0.0 }
 0x113   :  { %v976_v22 = vpop.eup %975 }
 0x114   :  { %v978_v23 = vpop.eup %977  ;;  %v308_v24 = vmul.f32 %v976_v22, %v303_v17 }
 0x115   :  { %v980_v25 = vpop.eup %979  ;;  %v315_v27 = vmul.f32 %v978_v23, %v304_v20 }
 0x116   :  { %v982_v28 = vpop.eup %981  ;;  %v310_v29 = vsel %vm309_vm2, %v303_v17, %v308_v24  ;;  %v322_v31 = vmul.f32 %v980_v25, %v305_v19  ;;  %v940_v17 = vpack.c.bf16 %v560_v15, %v559_v14  ;;  %v342_v24 = vld [vmem:[%s1411_s3] sm:$0xf] }
 0x117   :  { %v313_v32 = vsel %vm311_vm3, %v312_v26, %v310_v29  ;;  %v317_v33 = vsel %vm316_vm4, %v304_v20, %v315_v27  ;;  %v329_v34 = vmul.f32 %v982_v28, %v306_v21 }
 0x118   :  { %v320_v35 = vsel %vm318_vm5, %v319_v30, %v317_v33  ;;  %v324_v36 = vsel %vm323_vm6, %v305_v19, %v322_v31  ;;  %v592_v19 = vld [vmem:[%s1410_s5 + $0x178] sm:$0xff]  ;;  %941 = vmatpush3.bf16.msra.mxu0 %v940_v17 }
 0x119   :  { %v331_v38 = vsel %vm330_vm7, %v306_v21, %v329_v34  ;;  %v335_v39 = vadd.f32 %v320_v35, %v313_v32  ;;  %v327_v40 = vsel %vm325_vm8, %v326_v37, %v324_v36  ;;  %v972_v20 = vpack.c.bf16 %v592_v19, %v591_v18  ;;  %v506_v32 = vld [vmem:[%s1412_s4] sm:$0xf] }
 0x11a   :  { %v334_v43 = vsel %vm332_vm9, %v333_v41, %v331_v38  ;;  %v344_v21 = vlaneseq }
 0x11b   :  { %v336_v42 = vadd.f32 %v335_v39, %v327_v40  ;;  %973 = vmatpush3.bf16.msra.mxu1 %v972_v20 }
 0x11c   :  { %v345_v22 = vshrl.u32 %v344_v21, 7 }
 0x11d   :  { %v337_v44 = vadd.f32 %v336_v42, %v334_v43 }
 0x11e   :  { %v346_v23 = vsub.s32 0, %v345_v22  ;;  %v350_v25 = vsub.s32 1, %v345_v22  ;;  %v354_v26 = vsub.s32 2, %v345_v22  ;;  %v358_v27 = vsub.s32 3, %v345_v22 }
 0x11f   :  { %338 = vadd.xlane.f32.xlu0 %v337_v44 }
 0x120   :  { %v347_v28 = vrot.slane %v342_v24, %v346_v23  ;;  %v351_v29 = vrot.slane %v342_v24, %v350_v25  ;;  %v355_v30 = vrot.slane %v342_v24, %v354_v26  ;;  %v359_v31 = vrot.slane %v342_v24, %v358_v27 }
 0x122   :  { %v431_v35 = vadd.f32 %v430_v53, %v347_v28  ;;  %v433_v37 = vadd.f32 %v432_v61, %v351_v29  ;;  %v502_v38 = vadd.f32 %v501_v62, %v355_v30  ;;  %v504_v39 = vadd.f32 %v503_v4, %v359_v31  ;;  %v790_v4 = vld [vmem:[%s1415_s7] ss:$0 sm:$0xff] }
 0x1ac   :  { %v339_v33 = vpop.xlane.xlu0 %338 }
 0x1ad   :  { %v341_v34 = vmul.f32 0.001953125, %v339_v33 }
 0x1af   :  { %v507_v36 = vmul.f32 %v506_v32, %v341_v34 }
 0x1b1   :  { %v512_v40 = vrot.slane %v507_v36, %v346_v23  ;;  %v516_v41 = vrot.slane %v507_v36, %v350_v25  ;;  %v520_v42 = vrot.slane %v507_v36, %v354_v26  ;;  %v524_v43 = vrot.slane %v507_v36, %v358_v27 }
 0x1b3   :  { %v529_v44 = vadd.f32 %v512_v40, %v431_v35  ;;  %v530_v45 = vadd.f32 %v516_v41, %v433_v37  ;;  %v531_v46 = vadd.f32 %v520_v42, %v502_v38  ;;  %v532_v47 = vadd.f32 %v524_v43, %v504_v39 }
 0x1b5   :  { %v537_v48 = vmul.f32 0.2, %v529_v44  ;;  %v539_v49 = vmul.f32 0.2, %v531_v46  ;;  %vm534_vm10 = vcmp.gt.f32.partialorder %v530_v45, 0.0  ;;  %vm536_vm11 = vcmp.gt.f32.partialorder %v532_v47, 0.0 }
 0x1b6   :  { %v538_v50 = vmul.f32 0.2, %v530_v45  ;;  %v540_v51 = vmul.f32 0.2, %v532_v47  ;;  %vm533_vm12 = vcmp.gt.f32.partialorder %v529_v44, 0.0  ;;  %vm535_vm13 = vcmp.gt.f32.partialorder %v531_v46, 0.0 }
 0x1b7   :  { %v541_v52 = vsel %vm533_vm12, %v529_v44, %v537_v48  ;;  %v543_v53 = vsel %vm535_vm13, %v531_v46, %v539_v49 }
 0x1b8   :  { %v542_v54 = vsel %vm534_vm10, %v530_v45, %v538_v50  ;;  %v544_v55 = vsel %vm536_vm11, %v532_v47, %v540_v51 }
 0x1b9   :  { %680 = vmatprep.mubr.f32.mxu0 %v542_v54  ;;  %750 = vmatprep.mubr.f32.mxu1 %v544_v55 }
 0x1ba   :  { %681 = vmatmul.mubr.f32.vlgmr.msra.gmra.mrb[4].mxu0 %v541_v52  ;;  %751 = vmatmul.mubr.f32.vlgmr.msra.gmra.mrb[4].mxu1 %v543_v53 }
 0x28d   :  { %v824_v57 = vpop.f32.mrb[4].mxu0  ;;  %v859_v58 = vpop.f32.mrb[4].mxu1 }
 0x28e   :  { %v825_v60 = vpop.f32.mrb[5].mxu0  ;;  %v860_v61 = vpop.f32.mrb[5].mxu1 }
 0x28f   :  { %v826_v62 = vadd.f32 %v825_v60, %v824_v57  ;;  %v861_v63 = vadd.f32 %v860_v61, %v859_v58 }
 0x291   :  { %v683_v0 = vadd.f32 %v826_v62, %v789_v59 }
 0x293   :  { %v753_v1 = vadd.f32 %v861_v63, %v683_v0 }
 0x295   :  { %v757_v2 = vmul.f32 0.2, %v753_v1  ;;  %vm756_vm14 = vcmp.gt.f32.partialorder %v753_v1, 0.0 }
 0x297   :  { %v758_v5 = vsel %vm756_vm14, %v753_v1, %v757_v2 }
 0x298   :  { %v766_v6 = vmul.f32 %v790_v4, %v758_v5 }
 0x29a   :  { %v768_v7 = vsel %vm767_vm15, %v766_v6, 0.0 }
 0x29b   :  { %769 = vadd.xlane.f32.xlu0 %v768_v7 }
 0x328   :  { %v770_v9 = vpop.xlane.xlu0 %769 }
 0x329   :  { %v778_v10 = vadd.f32 %v791_v8, %v770_v9 }
 0x32b   :  { %780 = vst.msk [vmem:[%s1416_s9] sm:$0x3] %vm779_vm0, %v778_v10 }

</bundles_post_ra>
